<compile_context>
chip_gen: v6e
topology: v6e:2x2x1
jax: 0.10.0
libtpu: 0.0.40
codegen_flags: <defaults>
</compile_context>

<pallas_src>
import jax
import jax.numpy as jnp
from jax.experimental import pallas as pl
from jax.experimental.pallas import tpu as pltpu


# ---------------------------------------------------------------------------
# Kernels
# ---------------------------------------------------------------------------
def _dequant_bias_kernel(x_ref, scale_ref, bias_ref, o_ref):
    # x_ref:     (TM, TN)  quantized values (int8)
    # scale_ref: (TM, 1)   per-row scale (float32)
    # bias_ref:  (TM, 1)   per-row bias  (float32)
    # o_ref:     (TM, TN)  dequantized output
    x = x_ref[...].astype(jnp.float32)
    o_ref[...] = (x * scale_ref[...] + bias_ref[...]).astype(o_ref.dtype)


def _dequant_kernel(x_ref, scale_ref, o_ref):
    # Scale-only variant (bias is None).
    x = x_ref[...].astype(jnp.float32)
    o_ref[...] = (x * scale_ref[...]).astype(o_ref.dtype)


# ---------------------------------------------------------------------------
# Tile selection
# ---------------------------------------------------------------------------
def _round_up(x, m):
    return ((x + m - 1) // m) * m


# ~2M elements per tile: int8 in (2 MiB) + f32 out (8 MiB) per step,
# ~20 MiB double-buffered -> fits v7x's 64 MiB VMEM with headroom, and is
# large enough to amortize the ~0.35 us per-grid-step overhead everywhere.
_ELEM_BUDGET = 2 * 1024 * 1024


def _select_tiles(nc, hw):
    # Preferred: full-row TN so every DMA run is one contiguous row burst.
    if hw * 8 <= _ELEM_BUDGET:
        TN = hw  # full array dim -> legal even if not a multiple of 128
        rows_budget = _ELEM_BUDGET // max(hw, 1)
        if nc <= rows_budget:
            TM = nc  # full array dim -> legal for any nc
            # Whole array fits in one block; if it is still sizeable, split
            # rows so both v7x TensorCores get work (>= 2 parallel blocks).
            if nc >= 64 and nc * hw >= (1 << 20):
                TM = _round_up(pl.cdiv(nc, 2), 32)
        else:
            TM = max((rows_budget // 32) * 32, 8)  # sublane-aligned
        return TM, TN

    # Extremely wide rows: tile the lane axis in multiples of 128.
    TM = nc if nc < 32 else 32
    TN = max((_ELEM_BUDGET // max(TM, 1)) // 128 * 128, 128)
    TN = min(TN, _round_up(hw, 128))
    return TM, TN


# ---------------------------------------------------------------------------
# Wrapper
# ---------------------------------------------------------------------------
def dequantize(x_nchw, scale_c, bias_c=None, out_dtype=jnp.float32):
    """Dequantize an NCHW int8 tensor with per-channel scale / optional bias."""
    n, c, h, w = x_nchw.shape
    nc, hw = n * c, h * w

    # Contiguous reshape: no data movement.
    x2d = x_nchw.reshape(nc, hw)

    # Per-row params via broadcast_to (no materialized tile copy).
    scale_rows = jnp.broadcast_to(
        scale_c.astype(jnp.float32)[None, :], (n, c)).reshape(nc, 1)
    has_bias = bias_c is not None
    if has_bias:
        bias_rows = jnp.broadcast_to(
            bias_c.astype(jnp.float32)[None, :], (n, c)).reshape(nc, 1)

    TM, TN = _select_tiles(nc, hw)
    grid = (pl.cdiv(nc, TM), pl.cdiv(hw, TN))

    x_spec = pl.BlockSpec((TM, TN), lambda i, j: (i, j))
    row_spec = pl.BlockSpec((TM, 1), lambda i, j: (i, 0))
    out_spec = pl.BlockSpec((TM, TN), lambda i, j: (i, j))

    compiler_params = pltpu.CompilerParams(
        dimension_semantics=("parallel", "parallel"),
        # <= 48 MiB: keeps double-buffering intact on v7x (64 MiB physical)
        # while leaving plenty of room on v5e/v6e (128 MiB physical).
        vmem_limit_bytes=48 * 1024 * 1024,
    )

    out_bytes = jnp.dtype(out_dtype).itemsize
    n_param_streams = 2 if has_bias else 1
    # Honest (block-rounded) traffic estimate for XLA's scheduler.
    cost = pl.CostEstimate(
        flops=(2 if has_bias else 1) * nc * hw,
        transcendentals=0,
        bytes_accessed=(grid[0] * TM) * (grid[1] * TN) * (1 + out_bytes)
        + n_param_streams * (grid[0] * TM) * grid[1] * 4,
    )

    if has_bias:
        kernel, in_specs = _dequant_bias_kernel, [x_spec, row_spec, row_spec]
        operands = (x2d, scale_rows, bias_rows)
    else:
        kernel, in_specs = _dequant_kernel, [x_spec, row_spec]
        operands = (x2d, scale_rows)

    out2d = pl.pallas_call(
        kernel,
        out_shape=jax.ShapeDtypeStruct((nc, hw), out_dtype),
        grid=grid,
        in_specs=in_specs,
        out_specs=out_spec,
        compiler_params=compiler_params,
        cost_estimate=cost,
    )(*operands)

    # Contiguous reshape back to NCHW: no copy, no slice.
    return out2d.reshape(n, c, h, w)


# ---------------------------------------------------------------------------
# Self-test
# ---------------------------------------------------------------------------
if __name__ == "__main__":
    key = jax.random.PRNGKey(0)
    k1, k2, k3 = jax.random.split(key, 3)

    N, C, H, W = 2, 4, 16, 16

    # Deterministic synthetic "quantized" input and quant parameters.
    x = jax.random.randint(
        k1, (N, C, H, W), minval=-128, maxval=128, dtype=jnp.int32
    ).astype(jnp.int8)
    scale = jax.random.uniform(k2, (C,), dtype=jnp.float32, minval=0.01, maxval=0.1)
    bias = jax.random.normal(k3, (C,), dtype=jnp.float32)

    # Bias path.
    out = dequantize(x, scale, bias)
    jax.block_until_ready(out)
    ref = (x.astype(jnp.float32)
           * scale.reshape(1, C, 1, 1)
           + bias.reshape(1, C, 1, 1))
    assert jnp.allclose(out, ref, atol=1e-6), "mismatch vs reference (bias)"

    # bias=None path (module allows Optional[Tensor] bias) -> scale-only kernel.
    out_nb = dequantize(x, scale, None)
    jax.block_until_ready(out_nb)
    ref_nb = x.astype(jnp.float32) * scale.reshape(1, C, 1, 1)
    assert jnp.allclose(out_nb, ref_nb, atol=1e-6), "mismatch vs reference (no bias)"

    # Non-128-aligned spatial shape (exercises full-dim block path, no padding).
    k4, k5, k6 = jax.random.split(k3, 3)
    C2, H2, W2 = 3, 5, 7
    x_odd = jax.random.randint(
        k4, (N, C2, H2, W2), minval=-128, maxval=128, dtype=jnp.int32
    ).astype(jnp.int8)
    scale_odd = jax.random.uniform(k5, (C2,), jnp.float32, 0.01, 0.1)
    bias_odd = jax.random.normal(k6, (C2,), jnp.float32)
    out_odd = dequantize(x_odd, scale_odd, bias_odd)
    jax.block_until_ready(out_odd)
    ref_odd = (x_odd.astype(jnp.float32)
               * scale_odd.reshape(1, C2, 1, 1)
               + bias_odd.reshape(1, C2, 1, 1))
    assert jnp.allclose(out_odd, ref_odd, atol=1e-6), "mismatch vs reference (odd)"

    print("KERNEL_OK")
</pallas_src>

<mosaic_0001>
module attributes {stable_mosaic.version = 11 : i64} {
  func.func @_dequant_bias_kernel(%arg0: i32, %arg1: i32, %arg2: memref<8x256xi8, #tpu.memory_space<vmem>>, %arg3: memref<8x1xf32, #tpu.memory_space<vmem>>, %arg4: memref<8x1xf32, #tpu.memory_space<vmem>>, %arg5: memref<8x256xf32, #tpu.memory_space<vmem>>) attributes {dimension_semantics = [#tpu.dimension_semantics<parallel>, #tpu.dimension_semantics<parallel>], iteration_bounds = array<i64: 1, 1>, scalar_prefetch = 0 : i64, scratch_operands = 0 : i64, tpu.core_type = #tpu.core_type<tc>, window_params = [{transform_indices = @transform_0, window_bounds = array<i64: 8, 256>}, {transform_indices = @transform_1, window_bounds = array<i64: 8, 1>}, {transform_indices = @transform_2, window_bounds = array<i64: 8, 1>}, {transform_indices = @transform_3, window_bounds = array<i64: 8, 256>}]} {
    %c0 = arith.constant 0 : index
    %c0_0 = arith.constant 0 : index
    %0 = vector.load %arg2[%c0, %c0_0] : memref<8x256xi8, #tpu.memory_space<vmem>>, vector<8x256xi8>
    %1 = arith.sitofp %0 : vector<8x256xi8> to vector<8x256xf32>
    %c0_1 = arith.constant 0 : index
    %c0_2 = arith.constant 0 : index
    %2 = vector.load %arg3[%c0_1, %c0_2] : memref<8x1xf32, #tpu.memory_space<vmem>>, vector<8x1xf32>
    %3 = vector.broadcast %2 : vector<8x1xf32> to vector<8x256xf32>
    %4 = arith.mulf %1, %3 : vector<8x256xf32>
    %c0_3 = arith.constant 0 : index
    %c0_4 = arith.constant 0 : index
    %5 = vector.load %arg4[%c0_3, %c0_4] : memref<8x1xf32, #tpu.memory_space<vmem>>, vector<8x1xf32>
    %6 = vector.broadcast %5 : vector<8x1xf32> to vector<8x256xf32>
    %7 = arith.addf %4, %6 : vector<8x256xf32>
    %c0_5 = arith.constant 0 : index
    %c0_6 = arith.constant 0 : index
    %8 = vector.load %arg5[%c0_5, %c0_6] : memref<8x256xf32, #tpu.memory_space<vmem>>, vector<8x256xf32>
    tpu.vector_store %arg5[%c0_5, %c0_6], %7 {strides = array<i32>} : memref<8x256xf32, #tpu.memory_space<vmem>>, vector<8x256xf32>,
    return
  }
  func.func @transform_0(%arg0: i32, %arg1: i32) -> (i32, i32) {
    %c0_i32 = arith.constant 0 : i32
    return %arg0, %arg1 : i32, i32
  }
  func.func @transform_1(%arg0: i32, %arg1: i32) -> (i32, i32) {
    %c0_i32 = arith.constant 0 : i32
    %c0_i32_0 = arith.constant 0 : i32
    return %arg0, %c0_i32 : i32, i32
  }
  func.func @transform_2(%arg0: i32, %arg1: i32) -> (i32, i32) {
    %c0_i32 = arith.constant 0 : i32
    %c0_i32_0 = arith.constant 0 : i32
    return %arg0, %c0_i32 : i32, i32
  }
  func.func @transform_3(%arg0: i32, %arg1: i32) -> (i32, i32) {
    %c0_i32 = arith.constant 0 : i32
    return %arg0, %arg1 : i32, i32
  }
}

</mosaic_0001>

<bundles_post_ra>
// kernel: tpu_custom_call.1
= control target key start
LH: loop header
LB: loop body
LE: loop exit
PB: predicated region body
PF: predicated region fallthrough
CT: control target
= control target key end

     0   :  { %v77_v1 = vmov 0   ;;  %s111_s0 = inlined_call_operand.vmem [shape: s8[8,256], index: 0, kind: input, shape index: {}]   ;;  %s112_s1 = inlined_call_operand.vmem [shape: f32[8,1], index: 1, kind: input, shape index: {}]   ;;  %s113_s2 = inlined_call_operand.vmem [shape: f32[8,1], index: 2, kind: input, shape index: {}]   ;;  %s114_s3 = inlined_call_operand.hbm [shape: f32[8,256], index: 3, kind: output, shape index: {}]  }
   0x1   :  { %v20_v0 = vld [vmem:[%s112_s1] sm:$0xff]  ;;  %54 = vset.pattern.permute.xlu0 %v77_v1 }
   0x2   :  { %8 = vsyncpa [#allocation3], 0  ;;  %23 = vperm.xlu0 %54, %v20_v0   ;;  %v28_v2 = vld [vmem:[%s113_s2] sm:$0xff]  ;;  %s78_s18 = smov [#allocation2]  }
   0x3   :  { %v15_v3 = vld [vmem:[%s111_s0] sm:$0xf]  ;;  %s44_s1 = sshll.u32 %s78_s18, 4  ;;  %s45_s1 = int_to_ptr.vmem [resolvable:$true] %s44_s1 }
   0x4   :  { %v16_v4 = vunpack.c.0.s8 %v15_v3  ;;  %v17_v5 = vunpack.c.1.s8 %v15_v3  ;;  %s55_s2 = scalar_lea.vmem %s45_s1, 256  ;;  %p60_p1 = scmp.lt.s32.totalorder %s45_s1, %s45_s1 }
   0x5   :  { %p56_p0 = scmp.ne.s32.totalorder %s45_s1, %s55_s2  ;;  %p61_p2 = scmp.lt.s32.totalorder %s55_s2, %s55_s2 }
   0x6   :  { %31 = vperm.xlu0 %54, %v28_v2   ;;  %v18_v6 = vcvt.s32.f32 %v16_v4  ;;  %v19_v7 = vcvt.s32.f32 %v17_v5 }
   0x7   :  { %p62_p3 = por %p61_p2, %p60_p1 }
   0x9   :  { %p63_p4 = pnand %p62_p3, %p56_p0 }
  0x7d   :  { %v24_v8 = vpop.permute.xlu0 %23 }
  0x7e   :  { %v26_v9 = vmul.f32 %v24_v8, %v18_v6  ;;  %v27_v10 = vmul.f32 %v24_v8, %v19_v7 }
  0x81   :  { %v32_v11 = vpop.permute.xlu0 %31 }
  0x82   :  { %v34_v12 = vadd.f32 %v32_v11, %v26_v9  ;;  %v35_v13 = vadd.f32 %v32_v11, %v27_v10 }
  0x84   :  { %36 = vst [vmem:[#allocation2] sm:$0xff] %v34_v12  ;;  %37 = vst [vmem:[#allocation2 + $0x8] sm:$0xff] %v35_v13 }
  0x85   :  { %66 = shalt.err (!%p63_p4)
}
  0x86   :  { %47 = dma.vmem_to_hbm [thread:$0]  %s45_s1, 256, %s114_s3, [#allocation3]  }
  0x87   :  { %75 = dma.done.wait [#allocation3], 256  }
  0x88   :  { %76 = vsyncadd [#allocation3], 4294967040 }
  0x89   :  { %51 = vsyncpa [#allocation3], 1 }

</bundles_post_ra>
